<compile_context>
chip_gen: v7x
topology: tpu7x:2x2x1
jax: 0.10.0
libtpu: 0.0.40
codegen_flags: <defaults>
</compile_context>

<pallas_src>
import jax
import jax.numpy as jnp
from jax.experimental import pallas as pl
from jax.experimental.pallas import tpu as pltpu

HIDDEN = 512
BN_EPS = 1e-5
DROP_P = 0.2
KEEP_SCALE = 1.0 / (1.0 - DROP_P)
# For uniform uint32 bits: P(bits < threshold) == DROP_P.
DROP_THRESHOLD = int(DROP_P * (1 << 32))  # 858993459


def _encoder_kernel(x_ref,      # VMEM (B, 5n)      f32
                    w1_ref,     # VMEM (5n, 512)    bf16
                    vec_ref,    # VMEM (3, 512)     f32   rows: gamma, beta, b2
                    w2_ref,     # VMEM (512, 512)   bf16
                    bits_ref,   # VMEM (B, 512)     uint32 dropout bits
                    o_ref):     # VMEM (B, 512)     f32
    # ---- fc1 (bf16 MXU inputs, f32 accumulate).  fc1 bias omitted: it is
    #      cancelled exactly by the training-mode BatchNorm mean subtraction.
    h = jnp.dot(x_ref[...].astype(jnp.bfloat16), w1_ref[...],
                preferred_element_type=jnp.float32)

    # ---- BatchNorm1d (training mode, biased batch variance), folded into a
    #      single scale/shift FMA per element.
    gamma = vec_ref[0:1, :]
    beta = vec_ref[1:2, :]
    b2 = vec_ref[2:3, :]

    mean = jnp.mean(h, axis=0, keepdims=True)          # (1, 512)
    centered = h - mean
    var = jnp.mean(centered * centered, axis=0, keepdims=True)
    scale = gamma * jax.lax.rsqrt(var + BN_EPS)         # (1, 512)
    h = centered * scale + beta                         # one mul + one add / elem

    # ---- ReLU ----
    h = jnp.maximum(h, 0.0)

    # ---- Dropout(0.2): integer-space compare; 1/(1-p) folded into the select.
    keep_scale = jnp.where(bits_ref[...] >= jnp.uint32(DROP_THRESHOLD),
                           jnp.float32(KEEP_SCALE), jnp.float32(0.0))
    h = h * keep_scale

    # ---- fc2 (bf16 MXU inputs, f32 accumulate) + bias ----
    out = jnp.dot(h.astype(jnp.bfloat16), w2_ref[...],
                  preferred_element_type=jnp.float32) + b2
    o_ref[...] = out.astype(o_ref.dtype)


def encoder_box_seq(x, params, dropout_key):
    """Forward pass. x: (B, 5n) float32; params from init_params; dropout_key: PRNGKey."""
    B, in_dim = x.shape

    # TODO(synk): switch to in-kernel pltpu.prng_seed / pltpu.prng_random_bits
    # (seed mixed with pl.program_id if a grid is added) when targeting real
    # TPUs only; those primitives have no CPU/interpret lowering, so the
    # dropout bits are drawn here with jax.random instead.
    bits = jax.random.bits(dropout_key, (B, HIDDEN), dtype=jnp.uint32)

    vmem = pl.BlockSpec(memory_space=pltpu.MemorySpace.VMEM)

    flops = 2 * B * HIDDEN * (in_dim + HIDDEN)
    bytes_accessed = (x.size * 4
                      + params["w1"].size * 2
                      + params["w2"].size * 2
                      + params["vecs"].size * 4
                      + bits.size * 4
                      + B * HIDDEN * 4)

    return pl.pallas_call(
        _encoder_kernel,
        out_shape=jax.ShapeDtypeStruct((B, HIDDEN), jnp.float32),
        in_specs=[vmem, vmem, vmem, vmem, vmem],
        out_specs=vmem,
        cost_estimate=pl.CostEstimate(flops=flops,
                                      transcendentals=HIDDEN,   # rsqrt per feature
                                      bytes_accessed=bytes_accessed),
    )(x, params["w1"], params["vecs"], params["w2"], bits)


def init_params(key, n):
    """Deterministic synthetic parameters matching Encoder_box_seq(n)."""
    in_dim = 5 * n
    k1, k2, k3, k4 = jax.random.split(key, 4)
    lim1 = in_dim ** -0.5
    lim2 = HIDDEN ** -0.5
    w1 = jax.random.uniform(k1, (in_dim, HIDDEN), jnp.float32, -lim1, lim1)
    w2 = jax.random.uniform(k3, (HIDDEN, HIDDEN), jnp.float32, -lim2, lim2)
    gamma = jnp.ones((1, HIDDEN), jnp.float32)
    beta = jnp.zeros((1, HIDDEN), jnp.float32)
    b2 = jax.random.uniform(k4, (1, HIDDEN), jnp.float32, -lim2, lim2)
    # b1 is created for parity with the PyTorch module but is NOT passed to
    # the kernel: with training-mode BatchNorm (batch statistics) a per-feature
    # constant added before the mean subtraction cancels exactly.  It would
    # only matter if eval-mode (running-stats) BN were implemented.
    b1 = jax.random.uniform(k2, (1, HIDDEN), jnp.float32, -lim1, lim1)
    return {
        "w1": w1.astype(jnp.bfloat16),   # bf16 weights: native MXU rate, half the DMA
        "w2": w2.astype(jnp.bfloat16),
        "b1": b1,                        # unused by the kernel (see note above)
        # gamma / beta / fc2-bias packed into one (3, 512) operand -> one DMA.
        "vecs": jnp.concatenate([gamma, beta, b2], axis=0),
    }


if __name__ == "__main__":
    n = 4            # module hyper-parameter -> input features = 5*n = 20
    batch = 8
    key = jax.random.PRNGKey(0)
    pkey, xkey, dkey = jax.random.split(key, 3)

    params = init_params(pkey, n)
    x = jax.random.normal(xkey, (batch, 5 * n), dtype=jnp.float32)

    out = encoder_box_seq(x, params, dkey)
    jax.block_until_ready(out)

    assert out.shape == (batch, HIDDEN)
    assert bool(jnp.all(jnp.isfinite(out)))
    print("KERNEL_OK")
</pallas_src>

<mosaic_0001>
module attributes {stable_mosaic.version = 11 : i64} {
  func.func @_encoder_kernel(%arg0: memref<8x20xf32, #tpu.memory_space<vmem>>, %arg1: memref<20x512xbf16, #tpu.memory_space<vmem>>, %arg2: memref<3x512xf32, #tpu.memory_space<vmem>>, %arg3: memref<512x512xbf16, #tpu.memory_space<vmem>>, %arg4: memref<8x512xi32, #tpu.memory_space<vmem>>, %arg5: memref<8x512xf32, #tpu.memory_space<vmem>>) attributes {dimension_semantics = [], scalar_prefetch = 0 : i64, scratch_operands = 0 : i64, tpu.core_type = #tpu.core_type<tc>} {
    %c0 = arith.constant 0 : index
    %c0_0 = arith.constant 0 : index
    %0 = vector.load %arg0[%c0, %c0_0] : memref<8x20xf32, #tpu.memory_space<vmem>>, vector<8x20xf32>
    %1 = arith.truncf %0 : vector<8x20xf32> to vector<8x20xbf16>
    %c0_1 = arith.constant 0 : index
    %c0_2 = arith.constant 0 : index
    %2 = vector.load %arg1[%c0_1, %c0_2] : memref<20x512xbf16, #tpu.memory_space<vmem>>, vector<20x512xbf16>
    %cst = arith.constant dense<0.000000e+00> : vector<8x512xf32>
    %3 = tpu.matmul %1, %2, %cst {dimension_numbers = #tpu.dot_dimension_numbers<[1], [0], [0], [1], [0, 0, 1, 1], [], []>} : vector<8x20xbf16>, vector<20x512xbf16>, vector<8x512xf32> -> vector<8x512xf32>
    %c0_3 = arith.constant 0 : index
    %c0_4 = arith.constant 0 : index
    %4 = vector.load %arg2[%c0_3, %c0_4] : memref<3x512xf32, #tpu.memory_space<vmem>>, vector<1x512xf32>
    %c1 = arith.constant 1 : index
    %c0_5 = arith.constant 0 : index
    %5 = vector.load %arg2[%c1, %c0_5] : memref<3x512xf32, #tpu.memory_space<vmem>>, vector<1x512xf32>
    %c2 = arith.constant 2 : index
    %c0_6 = arith.constant 0 : index
    %6 = vector.load %arg2[%c2, %c0_6] : memref<3x512xf32, #tpu.memory_space<vmem>>, vector<1x512xf32>
    %cst_7 = arith.constant dense<0.000000e+00> : vector<512xf32>
    %7 = vector.multi_reduction <add>, %3, %cst_7 [0] : vector<8x512xf32> to vector<512xf32>
    %8 = vector.shape_cast %7 : vector<512xf32> to vector<1x512xf32>
    %cst_8 = arith.constant 8.000000e+00 : f32
    %9 = vector.broadcast %cst_8 : f32 to vector<1x512xf32>
    %10 = arith.divf %8, %9 : vector<1x512xf32>
    %11 = vector.broadcast %10 : vector<1x512xf32> to vector<8x512xf32>
    %12 = arith.subf %3, %11 : vector<8x512xf32>
    %13 = arith.mulf %12, %12 : vector<8x512xf32>
    %cst_9 = arith.constant dense<0.000000e+00> : vector<512xf32>
    %14 = vector.multi_reduction <add>, %13, %cst_9 [0] : vector<8x512xf32> to vector<512xf32>
    %15 = vector.shape_cast %14 : vector<512xf32> to vector<1x512xf32>
    %cst_10 = arith.constant 8.000000e+00 : f32
    %16 = vector.broadcast %cst_10 : f32 to vector<1x512xf32>
    %17 = arith.divf %15, %16 : vector<1x512xf32>
    %cst_11 = arith.constant 9.99999974E-6 : f32
    %18 = vector.broadcast %cst_11 : f32 to vector<1x512xf32>
    %19 = arith.addf %17, %18 : vector<1x512xf32>
    %20 = math.rsqrt %19 : vector<1x512xf32>
    %21 = arith.mulf %4, %20 : vector<1x512xf32>
    %22 = vector.broadcast %21 : vector<1x512xf32> to vector<8x512xf32>
    %23 = arith.mulf %12, %22 : vector<8x512xf32>
    %24 = vector.broadcast %5 : vector<1x512xf32> to vector<8x512xf32>
    %25 = arith.addf %23, %24 : vector<8x512xf32>
    %cst_12 = arith.constant 0.000000e+00 : f32
    %26 = vector.broadcast %cst_12 : f32 to vector<8x512xf32>
    %27 = arith.maximumf %25, %26 : vector<8x512xf32>
    %c0_13 = arith.constant 0 : index
    %c0_14 = arith.constant 0 : index
    %28 = vector.load %arg4[%c0_13, %c0_14] : memref<8x512xi32, #tpu.memory_space<vmem>>, vector<8x512xi32>
    %c858993459_i32 = arith.constant 858993459 : i32
    %29 = vector.broadcast %c858993459_i32 : i32 to vector<8x512xi32>
    %30 = arith.cmpi uge, %28, %29 : vector<8x512xi32>
    %cst_15 = arith.constant 1.250000e+00 : f32
    %cst_16 = arith.constant 0.000000e+00 : f32
    %31 = vector.broadcast %cst_15 : f32 to vector<8x512xf32>
    %32 = vector.broadcast %cst_16 : f32 to vector<8x512xf32>
    %33 = arith.select %30, %31, %32 : vector<8x512xi1>, vector<8x512xf32>
    %34 = arith.mulf %27, %33 : vector<8x512xf32>
    %35 = arith.truncf %34 : vector<8x512xf32> to vector<8x512xbf16>
    %c0_17 = arith.constant 0 : index
    %c0_18 = arith.constant 0 : index
    %36 = vector.load %arg3[%c0_17, %c0_18] : memref<512x512xbf16, #tpu.memory_space<vmem>>, vector<512x512xbf16>
    %cst_19 = arith.constant dense<0.000000e+00> : vector<8x512xf32>
    %37 = tpu.matmul %35, %36, %cst_19 {dimension_numbers = #tpu.dot_dimension_numbers<[1], [0], [0], [1], [0, 0, 1, 1], [], []>} : vector<8x512xbf16>, vector<512x512xbf16>, vector<8x512xf32> -> vector<8x512xf32>
    %38 = vector.broadcast %6 : vector<1x512xf32> to vector<8x512xf32>
    %39 = arith.addf %37, %38 : vector<8x512xf32>
    %c0_20 = arith.constant 0 : index
    %c0_21 = arith.constant 0 : index
    %40 = vector.load %arg5[%c0_20, %c0_21] : memref<8x512xf32, #tpu.memory_space<vmem>>, vector<8x512xf32>
    tpu.vector_store %arg5[%c0_20, %c0_21], %39 {strides = array<i32>} : memref<8x512xf32, #tpu.memory_space<vmem>>, vector<8x512xf32>,
    return
  }
}

</mosaic_0001>

<bundles_post_ra>
// kernel: tpu_custom_call.1
= control target key start
LH: loop header
LB: loop body
LE: loop exit
PB: predicated region body
PF: predicated region fallthrough
CT: control target
= control target key end

     0   :  { %10 = vsyncpa [#allocation3], 0  ;;  %s2052_s0 = inlined_call_operand.hbm [shape: f32[8,20], index: 0, kind: input, shape index: {}]   ;;  %s2053_s1 = inlined_call_operand.hbm [shape: bf16[20,512], index: 1, kind: input, shape index: {}]   ;;  %s2054_s2 = inlined_call_operand.hbm [shape: f32[3,512], index: 2, kind: input, shape index: {}]   ;;  %s2055_s3 = inlined_call_operand.hbm [shape: bf16[512,512], index: 3, kind: input, shape index: {}]   ;;  %s2056_s4 = inlined_call_operand.hbm [shape: u32[8,512], index: 4, kind: input, shape index: {}]   ;;  %s2057_s5 = inlined_call_operand.hbm [shape: f32[8,512], index: 5, kind: output, shape index: {}]  }
   0x1   :  { %11 = vsyncpa [#allocation6], 0 }
   0x2   :  { %12 = vsyncpa [#allocation9], 0 }
   0x3   :  { %13 = vsyncpa [#allocation4], 0  ;;  %s1890_s18 = smov [#allocation5]   ;;  %s1750_s22 = scalar_lea.hbm %s2053_s1, 768 }
   0x4   :  { %s29_s19 = sshll.u32 %s1890_s18, 4  ;;  %p1751_p0 = scmp.ne.s32.totalorder %s2053_s1, %s1750_s22  ;;  %s30_s19 = int_to_ptr.vmem [resolvable:$true] %s29_s19 }
   0x5   :  { %p1754_p1 = scmp.lt.u32.totalorder %s1750_s22, %s2053_s1 }
   0x7   :  { %p1756_p2 = pnand %p1754_p1, %p1751_p0 }
   0x9   :  { %1759 = shalt.err (!%p1756_p2)
}
   0xa   :  { %s1760_s27 = scalar_lea.vmem %s30_s19, 768  ;;  %p1765_p4 = scmp.lt.s32.totalorder %s30_s19, %s30_s19 }
   0xb   :  { %p1761_p3 = scmp.ne.s32.totalorder %s30_s19, %s1760_s27  ;;  %p1766_p5 = scmp.lt.s32.totalorder %s1760_s27, %s1760_s27 }
   0xd   :  { %p1767_p6 = por %p1766_p5, %p1765_p4 }
   0xf   :  { %p1768_p7 = pnand %p1767_p6, %p1761_p3 }
  0x11   :  { %1771 = shalt.err (!%p1768_p7)
}
  0x12   :  { %s1891_s28 = smov 256   ;;  %s1892_s29 = smov 16  }
  0x13   :  { %35 = dma.hbm_to_vmem [thread:$0]  %s2053_s1, 768, %s30_s19, [#allocation6], %s1891_s28, %s1891_s28, %s1892_s29  }
  0x14   :  { %s1893_s7 = smov [#allocation8]   ;;  %s1894_s9 = smov [#allocation2]  }
  0x15   :  { %s51_s8 = sshll.u32 %s1893_s7, 4  ;;  %s20_s10 = sshll.u32 %s1894_s9, 4  ;;  %s52_s8 = int_to_ptr.vmem [resolvable:$true] %s51_s8  ;;  %s21_s10 = int_to_ptr.vmem [resolvable:$true] %s20_s10 }
  0x16   :  { %s1772_s13 = scalar_lea.hbm %s2055_s3, 16384 }
  0x17   :  { %p1773_p8 = scmp.ne.s32.totalorder %s2055_s3, %s1772_s13  ;;  %p1776_p9 = scmp.lt.u32.totalorder %s1772_s13, %s2055_s3 }
  0x19   :  { %p1778_p10 = pnand %p1776_p9, %p1773_p8 }
  0x1b   :  { %1781 = shalt.err (!%p1778_p10)
}
  0x1c   :  { %s1782_s1 = scalar_lea.vmem %s52_s8, 16384  ;;  %p1787_p12 = scmp.lt.s32.totalorder %s52_s8, %s52_s8 }
  0x1d   :  { %p1783_p11 = scmp.ne.s32.totalorder %s52_s8, %s1782_s1  ;;  %p1788_p13 = scmp.lt.s32.totalorder %s1782_s1, %s1782_s1 }
  0x1f   :  { %p1789_p0 = por %p1788_p13, %p1787_p12 }
  0x21   :  { %p1790_p1 = pnand %p1789_p0, %p1783_p11 }
  0x23   :  { %1793 = shalt.err (!%p1790_p1)
}
  0x24   :  { %57 = dma.hbm_to_vmem [thread:$0]  %s2055_s3, 16384, %s52_s8, [#allocation9], %s1891_s28, %s1891_s28, %s1892_s29  }
  0x25   :  { %s1794_s22 = scalar_lea.hbm %s2052_s0, 128 }
  0x26   :  { %p1795_p2 = scmp.ne.s32.totalorder %s2052_s0, %s1794_s22  ;;  %p1798_p3 = scmp.lt.u32.totalorder %s1794_s22, %s2052_s0 }
  0x28   :  { %p1800_p4 = pnand %p1798_p3, %p1795_p2 }
  0x2a   :  { %1803 = shalt.err (!%p1800_p4)
}
  0x2b   :  { %s1804_s27 = scalar_lea.vmem %s21_s10, 128  ;;  %p1809_p6 = scmp.lt.s32.totalorder %s21_s10, %s21_s10 }
  0x2c   :  { %p1805_p5 = scmp.ne.s32.totalorder %s21_s10, %s1804_s27  ;;  %p1810_p7 = scmp.lt.s32.totalorder %s1804_s27, %s1804_s27 }
  0x2e   :  { %p1811_p8 = por %p1810_p7, %p1809_p6 }
  0x30   :  { %p1812_p9 = pnand %p1811_p8, %p1805_p5 }
  0x32   :  { %1815 = shalt.err (!%p1812_p9)
}
  0x33   :  { %23 = dma.hbm_to_vmem [thread:$0]  %s2052_s0, 128, %s21_s10, [#allocation3]  }
  0x34   :  { %s1895_s29 = smov [#allocation7]   ;;  %s1896_s6 = smov [#allocation10]  }
  0x35   :  { %s42_s30 = sshll.u32 %s1895_s29, 4  ;;  %s64_s7 = sshll.u32 %s1896_s6, 4  ;;  %s43_s30 = int_to_ptr.vmem [resolvable:$true] %s42_s30  ;;  %s65_s7 = int_to_ptr.vmem [resolvable:$true] %s64_s7 }
  0x36   :  { %s1816_s11 = scalar_lea.hbm %s2054_s2, 256 }
  0x37   :  { %p1817_p10 = scmp.ne.s32.totalorder %s2054_s2, %s1816_s11  ;;  %p1820_p11 = scmp.lt.u32.totalorder %s1816_s11, %s2054_s2 }
  0x39   :  { %p1822_p12 = pnand %p1820_p11, %p1817_p10 }
  0x3b   :  { %1825 = shalt.err (!%p1822_p12)
}
  0x3c   :  { %s1826_s0 = scalar_lea.vmem %s43_s30, 256  ;;  %p1831_p0 = scmp.lt.s32.totalorder %s43_s30, %s43_s30 }
  0x3d   :  { %p1827_p13 = scmp.ne.s32.totalorder %s43_s30, %s1826_s0  ;;  %p1832_p1 = scmp.lt.s32.totalorder %s1826_s0, %s1826_s0 }
  0x3f   :  { %p1833_p2 = por %p1832_p1, %p1831_p0 }
  0x41   :  { %p1834_p3 = pnand %p1833_p2, %p1827_p13 }
  0x43   :  { %1837 = shalt.err (!%p1834_p3)
}
  0x44   :  { %45 = dma.hbm_to_vmem [thread:$0]  %s2054_s2, 256, %s43_s30, [#allocation6]  }
  0x45   :  { %s1838_s18 = scalar_lea.hbm %s2056_s4, 512 }
  0x46   :  { %p1839_p4 = scmp.ne.s32.totalorder %s2056_s4, %s1838_s18  ;;  %p1842_p5 = scmp.lt.u32.totalorder %s1838_s18, %s2056_s4 }
  0x48   :  { %p1844_p6 = pnand %p1842_p5, %p1839_p4 }
  0x4a   :  { %1847 = shalt.err (!%p1844_p6)
}
  0x4b   :  { %s1848_s23 = scalar_lea.vmem %s65_s7, 512  ;;  %p1853_p8 = scmp.lt.s32.totalorder %s65_s7, %s65_s7 }
  0x4c   :  { %p1849_p7 = scmp.ne.s32.totalorder %s65_s7, %s1848_s23  ;;  %p1854_p9 = scmp.lt.s32.totalorder %s1848_s23, %s1848_s23 }
  0x4e   :  { %p1855_p10 = por %p1854_p9, %p1853_p8 }
  0x50   :  { %p1856_p11 = pnand %p1855_p10, %p1849_p7 }
  0x52   :  { %1859 = shalt.err (!%p1856_p11)
}
  0x53   :  { %67 = dma.hbm_to_vmem [thread:$0]  %s2056_s4, 512, %s65_s7, [#allocation9]  }
  0x54   :  { %1882 = dma.done.wait [#allocation3], 128  }
  0x55   :  { %1883 = vsyncadd [#allocation3], 4294967168 }
  0x56   :  { %1884 = dma.done.wait [#allocation6], 1024  }
  0x57   :  { %1885 = vsyncadd [#allocation6], 4294966272 }
  0x58   :  { %1886 = dma.done.wait [#allocation9], 16896  }
  0x59   :  { %1887 = vsyncadd [#allocation9], 4294950400  ;;  %v1897_v0 = vmov 0   ;;  %v1540_v1 = vld [vmem:[#allocation5 + $0x4] ss:$16 sps:$4 sm:$0xff]   ;;  %vm126_vm0 = vcmask 1041408  }
  0x5a   :  { %171 = vmatprep.mubr.bf16.mxu0 %v1897_v0  ;;  %212 = vmatprep.mubr.bf16.mxu1 %v1897_v0  ;;  %v1542_v2 = vld [vmem:[#allocation5 + $0xc] ss:$16 sps:$4 sm:$0xff]   ;;  %v1544_v3 = vld [vmem:[#allocation5] ss:$16 sps:$4 sm:$0xff]   ;;  %v1545_v4 = vld [vmem:[#allocation5 + $0x8] ss:$16 sps:$4 sm:$0xff]  }
  0x5b   :  { %139 = vmatprep.subr.bf16.mxu0 %v1540_v1  ;;  %v90_v5 = vld [vmem:[#allocation5 + $0x20] sm:$0x33]  ;;  %180 = vmatprep.subr.bf16.mxu1 %v1542_v2  ;;  %v91_v7 = vld [vmem:[#allocation5 + $0x28] sm:$0x33]  ;;  %v84_v9 = vld [vmem:[#allocation2] sm:$0xff]  ;;  %vm122_vm1 = vcmask 162816  }
  0x5c   :  { %v1382_v6 = vcombine.high %v90_v5, %v90_v5  ;;  %v1381_v8 = vcombine.low %v90_v5, %v90_v5  ;;  %140 = vmatpush1.bf16.msra.mxu0 %v1544_v3  ;;  %181 = vmatpush1.bf16.msra.mxu1 %v1545_v4  ;;  %v1384_v10 = vcombine.high %v91_v7, %v91_v7  ;;  %v1552_v15 = vld [vmem:[#allocation8 + $0x4] ss:$16 sps:$4 sm:$0xff]   ;;  %v1555_v16 = vld [vmem:[#allocation8 + $0xc] ss:$16 sps:$4 sm:$0xff]   ;;  %v1550_v17 = vld [vmem:[#allocation8] ss:$16 sps:$4 sm:$0xff]  }
  0x5d   :  { %v1383_v11 = vcombine.low %v91_v7, %v91_v7  ;;  %v85_v14 = vpack.c.bf16 %v84_v9, %v84_v9  ;;  %v1553_v18 = vld [vmem:[#allocation8 + $0x8] ss:$16 sps:$4 sm:$0xff]   ;;  %v1558_v19 = vld [vmem:[#allocation8 + $0x24] ss:$16 sps:$4 sm:$0xff]   ;;  %v1561_v20 = vld [vmem:[#allocation8 + $0x2c] ss:$16 sps:$4 sm:$0xff]  }
  0x5e   :  { %1385 = vmatprep.subr.msk.bf16.mxu0 %vm126_vm0, %v1382_v6  ;;  %v128_v12 = vsel %vm126_vm0, %v1381_v8, 0  ;;  %1387 = vmatprep.subr.msk.bf16.mxu1 %vm126_vm0, %v1384_v10  ;;  %v1556_v21 = vld [vmem:[#allocation8 + $0x20] ss:$16 sps:$4 sm:$0xff]   ;;  %v1559_v22 = vld [vmem:[#allocation8 + $0x28] ss:$16 sps:$4 sm:$0xff]   ;;  %s1900_s4 = smov [#allocation11]  }
  0x5f   :  { %v134_v13 = vsel %vm126_vm0, %v1383_v11, 0  ;;  %v1564_v23 = vld [vmem:[#allocation8 + $0x44] ss:$16 sps:$4 sm:$0xff]   ;;  %v1567_v24 = vld [vmem:[#allocation8 + $0x4c] ss:$16 sps:$4 sm:$0xff]   ;;  %s1366_s25 = sshll.u32 %s1900_s4, 4  ;;  %s1367_s25 = int_to_ptr.vmem [resolvable:$true] %s1366_s25 }
  0x60   :  { %142 = vmatpush1.bf16.msra.mxu0 %v128_v12  ;;  %183 = vmatpush1.bf16.msra.mxu1 %v134_v13  ;;  %v1562_v25 = vld [vmem:[#allocation8 + $0x40] ss:$16 sps:$4 sm:$0xff]   ;;  %v1565_v26 = vld [vmem:[#allocation8 + $0x48] ss:$16 sps:$4 sm:$0xff]   ;;  %v1570_v27 = vld [vmem:[#allocation8 + $0x64] ss:$16 sps:$4 sm:$0xff]   ;;  %p1865_p13 = scmp.lt.s32.totalorder %s1367_s25, %s1367_s25 }
  0x61   :  { %1192 = vmatprep.subr.bf16.mxu0 %v1552_v15  ;;  %1274 = vmatprep.subr.bf16.mxu1 %v1555_v16  ;;  %v1573_v28 = vld [vmem:[#allocation8 + $0x6c] ss:$16 sps:$4 sm:$0xff]   ;;  %v1568_v29 = vld [vmem:[#allocation8 + $0x60] ss:$16 sps:$4 sm:$0xff]   ;;  %v1571_v30 = vld [vmem:[#allocation8 + $0x68] ss:$16 sps:$4 sm:$0xff]  }
  0x62   :  { %v1576_v31 = vld [vmem:[#allocation8 + $0x84] ss:$16 sps:$4 sm:$0xff]   ;;  %v1579_v32 = vld [vmem:[#allocation8 + $0x8c] ss:$16 sps:$4 sm:$0xff]   ;;  %v1574_v33 = vld [vmem:[#allocation8 + $0x80] ss:$16 sps:$4 sm:$0xff]  }
  0x63   :  { %1386 = vmatmul.mubr.msk.bf16.vlgmr.msra.gmra.mrb[0].mxu0 %vm122_vm1, %v85_v14  ;;  %1388 = vmatmul.mubr.msk.bf16.vlgmr.msra.gmra.mrb[0].mxu1 %vm122_vm1, %v85_v14  ;;  %v1577_v34 = vld [vmem:[#allocation8 + $0x88] ss:$16 sps:$4 sm:$0xff]   ;;  %v1582_v35 = vld [vmem:[#allocation8 + $0xa4] ss:$16 sps:$4 sm:$0xff]   ;;  %v1585_v36 = vld [vmem:[#allocation8 + $0xac] ss:$16 sps:$4 sm:$0xff]  }
  0x64   :  { %1193 = vmatpush1.bf16.msra.mxu0 %v1550_v17  ;;  %1275 = vmatpush1.bf16.msra.mxu1 %v1553_v18  ;;  %v1580_v37 = vld [vmem:[#allocation8 + $0xa0] ss:$16 sps:$4 sm:$0xff]   ;;  %v1583_v38 = vld [vmem:[#allocation8 + $0xa8] ss:$16 sps:$4 sm:$0xff]   ;;  %v1588_v39 = vld [vmem:[#allocation8 + $0xc4] ss:$16 sps:$4 sm:$0xff]  }
  0x65   :  { %1194 = vmatprep.subr.bf16.mxu0 %v1558_v19  ;;  %1276 = vmatprep.subr.bf16.mxu1 %v1561_v20  ;;  %v1591_v40 = vld [vmem:[#allocation8 + $0xcc] ss:$16 sps:$4 sm:$0xff]   ;;  %v1586_v41 = vld [vmem:[#allocation8 + $0xc0] ss:$16 sps:$4 sm:$0xff]   ;;  %v1589_v42 = vld [vmem:[#allocation8 + $0xc8] ss:$16 sps:$4 sm:$0xff]  }
  0x66   :  { %v1594_v43 = vld [vmem:[#allocation8 + $0xe4] ss:$16 sps:$4 sm:$0xff]   ;;  %v1597_v44 = vld [vmem:[#allocation8 + $0xec] ss:$16 sps:$4 sm:$0xff]   ;;  %v1592_v45 = vld [vmem:[#allocation8 + $0xe0] ss:$16 sps:$4 sm:$0xff]  }
  0x67   :  { %v1595_v46 = vld [vmem:[#allocation8 + $0xe8] ss:$16 sps:$4 sm:$0xff]   ;;  %v1600_v47 = vld [vmem:[#allocation8 + $0x104] ss:$16 sps:$4 sm:$0xff]   ;;  %v1598_v48 = vld [vmem:[#allocation8 + $0x100] ss:$16 sps:$4 sm:$0xff]  }
  0x68   :  { %1195 = vmatpush1.bf16.msra.mxu0 %v1556_v21  ;;  %1277 = vmatpush1.bf16.msra.mxu1 %v1559_v22  ;;  %v1601_v49 = vld [vmem:[#allocation8 + $0x108] ss:$16 sps:$4 sm:$0xff]   ;;  %v1603_v50 = vld [vmem:[#allocation8 + $0x10c] ss:$16 sps:$4 sm:$0xff]   ;;  %v1606_v51 = vld [vmem:[#allocation8 + $0x124] ss:$16 sps:$4 sm:$0xff]  }
  0x69   :  { %1196 = vmatprep.subr.bf16.mxu0 %v1564_v23  ;;  %1278 = vmatprep.subr.bf16.mxu1 %v1567_v24  ;;  %v1609_v52 = vld [vmem:[#allocation8 + $0x12c] ss:$16 sps:$4 sm:$0xff]   ;;  %v1604_v53 = vld [vmem:[#allocation8 + $0x120] ss:$16 sps:$4 sm:$0xff]   ;;  %v1607_v54 = vld [vmem:[#allocation8 + $0x128] ss:$16 sps:$4 sm:$0xff]  }
  0x6a   :  { %v1612_v55 = vld [vmem:[#allocation8 + $0x144] ss:$16 sps:$4 sm:$0xff]   ;;  %v1615_v56 = vld [vmem:[#allocation8 + $0x14c] ss:$16 sps:$4 sm:$0xff]   ;;  %v1610_v57 = vld [vmem:[#allocation8 + $0x140] ss:$16 sps:$4 sm:$0xff]  }
  0x6b   :  { %v1613_v58 = vld [vmem:[#allocation8 + $0x148] ss:$16 sps:$4 sm:$0xff]   ;;  %v1618_v59 = vld [vmem:[#allocation8 + $0x164] ss:$16 sps:$4 sm:$0xff]   ;;  %v1621_v60 = vld [vmem:[#allocation8 + $0x16c] ss:$16 sps:$4 sm:$0xff]  }
  0x6c   :  { %1197 = vmatpush1.bf16.msra.mxu0 %v1562_v25  ;;  %1279 = vmatpush1.bf16.msra.mxu1 %v1565_v26  ;;  %v1616_v61 = vld [vmem:[#allocation8 + $0x160] ss:$16 sps:$4 sm:$0xff]   ;;  %v1619_v62 = vld [vmem:[#allocation8 + $0x168] ss:$16 sps:$4 sm:$0xff]   ;;  %v1624_v63 = vld [vmem:[#allocation8 + $0x184] ss:$16 sps:$4 sm:$0xff]  }
  0x6d   :  { %1198 = vmatprep.subr.bf16.mxu0 %v1570_v27  ;;  %1280 = vmatprep.subr.bf16.mxu1 %v1573_v28  ;;  %v1627_v0 = vld [vmem:[#allocation8 + $0x18c] ss:$16 sps:$4 sm:$0xff]   ;;  %v1622_v1 = vld [vmem:[#allocation8 + $0x180] ss:$16 sps:$4 sm:$0xff]   ;;  %v1625_v2 = vld [vmem:[#allocation8 + $0x188] ss:$16 sps:$4 sm:$0xff]  }
  0x6e   :  { %v1630_v3 = vld [vmem:[#allocation8 + $0x1a4] ss:$16 sps:$4 sm:$0xff]   ;;  %v1633_v4 = vld [vmem:[#allocation8 + $0x1ac] ss:$16 sps:$4 sm:$0xff]   ;;  %v1628_v5 = vld [vmem:[#allocation8 + $0x1a0] ss:$16 sps:$4 sm:$0xff]  }
  0x6f   :  { %v1631_v6 = vld [vmem:[#allocation8 + $0x1a8] ss:$16 sps:$4 sm:$0xff]   ;;  %v1634_v7 = vld [vmem:[#allocation8 + $0x1c0] ss:$16 sps:$4 sm:$0xff]   ;;  %v1636_v8 = vld [vmem:[#allocation8 + $0x1c4] ss:$16 sps:$4 sm:$0xff]  }
  0x70   :  { %1199 = vmatpush1.bf16.msra.mxu0 %v1568_v29  ;;  %1281 = vmatpush1.bf16.msra.mxu1 %v1571_v30  ;;  %v1637_v9 = vld [vmem:[#allocation8 + $0x1c8] ss:$16 sps:$4 sm:$0xff]   ;;  %v1639_v10 = vld [vmem:[#allocation8 + $0x1cc] ss:$16 sps:$4 sm:$0xff]   ;;  %v1642_v11 = vld [vmem:[#allocation8 + $0x1e4] ss:$16 sps:$4 sm:$0xff]  }
  0x71   :  { %1200 = vmatprep.subr.bf16.mxu0 %v1576_v31  ;;  %1282 = vmatprep.subr.bf16.mxu1 %v1579_v32  ;;  %v1645_v12 = vld [vmem:[#allocation8 + $0x1ec] ss:$16 sps:$4 sm:$0xff]   ;;  %v1640_v13 = vld [vmem:[#allocation8 + $0x1e0] ss:$16 sps:$4 sm:$0xff]   ;;  %v1643_v14 = vld [vmem:[#allocation8 + $0x1e8] ss:$16 sps:$4 sm:$0xff]  }
  0x72   :  { %v1648_v15 = vld [vmem:[#allocation8 + $0x204] ss:$16 sps:$4 sm:$0xff]   ;;  %v1651_v16 = vld [vmem:[#allocation8 + $0x20c] ss:$16 sps:$4 sm:$0xff]   ;;  %s1860_s26 = scalar_lea.vmem %s1367_s25, 512 }
  0x73   :  { %p1861_p12 = scmp.ne.s32.totalorder %s1367_s25, %s1860_s26  ;;  %p1866_p0 = scmp.lt.s32.totalorder %s1860_s26, %s1860_s26 }
  0x74   :  { %1201 = vmatpush1.bf16.msra.mxu0 %v1574_v33  ;;  %1283 = vmatpush1.bf16.msra.mxu1 %v1577_v34 }
  0x75   :  { %1202 = vmatprep.subr.bf16.mxu0 %v1582_v35  ;;  %1284 = vmatprep.subr.bf16.mxu1 %v1585_v36  ;;  %p1867_p1 = por %p1866_p0, %p1865_p13 }
  0x77   :  { %p1868_p2 = pnand %p1867_p1, %p1861_p12 }
  0x78   :  { %1203 = vmatpush1.bf16.msra.mxu0 %v1580_v37  ;;  %1285 = vmatpush1.bf16.msra.mxu1 %v1583_v38 }
  0x79   :  { %1204 = vmatprep.subr.bf16.mxu0 %v1588_v39  ;;  %1286 = vmatprep.subr.bf16.mxu1 %v1591_v40 }
  0x7c   :  { %1205 = vmatpush1.bf16.msra.mxu0 %v1586_v41  ;;  %1287 = vmatpush1.bf16.msra.mxu1 %v1589_v42 }
  0x7d   :  { %1206 = vmatprep.subr.bf16.mxu0 %v1594_v43  ;;  %1288 = vmatprep.subr.bf16.mxu1 %v1597_v44 }
  0x80   :  { %1207 = vmatpush1.bf16.msra.mxu0 %v1592_v45  ;;  %1289 = vmatpush1.bf16.msra.mxu1 %v1595_v46 }
  0x81   :  { %1208 = vmatprep.subr.bf16.mxu0 %v1600_v47  ;;  %1290 = vmatprep.subr.bf16.mxu1 %v1603_v50 }
  0x84   :  { %1209 = vmatpush1.bf16.msra.mxu0 %v1598_v48  ;;  %1291 = vmatpush1.bf16.msra.mxu1 %v1601_v49 }
  0x85   :  { %1210 = vmatprep.subr.bf16.mxu0 %v1606_v51  ;;  %1292 = vmatprep.subr.bf16.mxu1 %v1609_v52 }
  0x88   :  { %1211 = vmatpush1.bf16.msra.mxu0 %v1604_v53  ;;  %1293 = vmatpush1.bf16.msra.mxu1 %v1607_v54 }
  0x89   :  { %1212 = vmatprep.subr.bf16.mxu0 %v1612_v55  ;;  %1294 = vmatprep.subr.bf16.mxu1 %v1615_v56 }
  0x8c   :  { %1213 = vmatpush1.bf16.msra.mxu0 %v1610_v57  ;;  %1295 = vmatpush1.bf16.msra.mxu1 %v1613_v58 }
  0x8d   :  { %1214 = vmatprep.subr.bf16.mxu0 %v1618_v59  ;;  %1296 = vmatprep.subr.bf16.mxu1 %v1621_v60 }
  0x90   :  { %1215 = vmatpush1.bf16.msra.mxu0 %v1616_v61  ;;  %1297 = vmatpush1.bf16.msra.mxu1 %v1619_v62 }
  0x91   :  { %1216 = vmatprep.subr.bf16.mxu0 %v1624_v63  ;;  %1298 = vmatprep.subr.bf16.mxu1 %v1627_v0 }
  0x94   :  { %1217 = vmatpush1.bf16.msra.mxu0 %v1622_v1  ;;  %1299 = vmatpush1.bf16.msra.mxu1 %v1625_v2 }
  0x95   :  { %1218 = vmatprep.subr.bf16.mxu0 %v1630_v3  ;;  %1300 = vmatprep.subr.bf16.mxu1 %v1633_v4 }
  0x98   :  { %1219 = vmatpush1.bf16.msra.mxu0 %v1628_v5  ;;  %1301 = vmatpush1.bf16.msra.mxu1 %v1631_v6 }
  0x99   :  { %1220 = vmatprep.subr.bf16.mxu0 %v1636_v8  ;;  %1302 = vmatprep.subr.bf16.mxu1 %v1639_v10 }
  0x9c   :  { %1221 = vmatpush1.bf16.msra.mxu0 %v1634_v7  ;;  %1303 = vmatpush1.bf16.msra.mxu1 %v1637_v9 }
  0x9d   :  { %1222 = vmatprep.subr.bf16.mxu0 %v1642_v11  ;;  %1304 = vmatprep.subr.bf16.mxu1 %v1645_v12 }
  0xa0   :  { %1223 = vmatpush1.bf16.msra.mxu0 %v1640_v13  ;;  %1305 = vmatpush1.bf16.msra.mxu1 %v1643_v14 }
  0xa1   :  { %1233 = vmatprep.subr.bf16.mxu0 %v1648_v15  ;;  %1315 = vmatprep.subr.bf16.mxu1 %v1651_v16 }
 0x136   :  { %v173_v17 = vpop.f32.mrb[0].mxu0  ;;  %v214_v18 = vpop.f32.mrb[0].mxu1 }
 0x137   :  { %v226_v19 = vrot.slane %v173_v17, 4  ;;  %v238_v20 = vrot.slane %v214_v18, 4  ;;  %v175_v21 = vpop.f32.mrb[1].mxu0  ;;  %v216_v22 = vpop.f32.mrb[1].mxu1 }
 0x138   :  { %v232_v23 = vrot.slane %v175_v21, 4  ;;  %v244_v24 = vrot.slane %v216_v22, 4  ;;  %v177_v25 = vpop.f32.mrb[2].mxu0  ;;  %v218_v26 = vpop.f32.mrb[2].mxu1 }
 0x139   :  { %v227_v27 = vadd.f32 %v226_v19, %v173_v17  ;;  %v239_v28 = vadd.f32 %v238_v20, %v214_v18  ;;  %v178_v29 = vpop.f32.mrb[3].mxu0  ;;  %v219_v30 = vpop.f32.mrb[3].mxu1 }
 0x13a   :  { %v233_v31 = vadd.f32 %v232_v23, %v175_v21  ;;  %v245_v32 = vadd.f32 %v244_v24, %v216_v22  ;;  %v1898_v29 = vmov 1966171168  }
 0x13b   :  { %v228_v33 = vrot.slane %v227_v27, 2  ;;  %v240_v34 = vrot.slane %v239_v28, 2  ;;  %v306_v30 = vunpack.c.l.s4 %v1898_v29  ;;  %v1655_v29 = vld [vmem:[#allocation8 + $0x228] ss:$16 sps:$4 sm:$0xff]  }
 0x13c   :  { %v234_v35 = vrot.slane %v233_v31, 2  ;;  %v246_v36 = vrot.slane %v245_v32, 2 }
 0x13d   :  { %v229_v37 = vadd.f32 %v228_v33, %v227_v27  ;;  %v241_v38 = vadd.f32 %v240_v34, %v239_v28 }
 0x13e   :  { %v235_v39 = vadd.f32 %v234_v35, %v233_v31  ;;  %v247_v40 = vadd.f32 %v246_v36, %v245_v32  ;;  %v308_v31 = vlaneseq  ;;  %v307_v32 = vunpack.c.0.s8 %v306_v30  ;;  %v1660_v30 = vld [vmem:[#allocation8 + $0x244] ss:$16 sps:$4 sm:$0xff]  }
 0x13f   :  { %v230_v41 = vrot.slane %v229_v37, 1  ;;  %v242_v42 = vrot.slane %v241_v38, 1 }
 0x140   :  { %v236_v43 = vrot.slane %v235_v39, 1  ;;  %v248_v44 = vrot.slane %v247_v40, 1  ;;  %v309_v33 = vshrl.u32 %v308_v31, 7  ;;  %v1663_v31 = vld [vmem:[#allocation8 + $0x24c] ss:$16 sps:$4 sm:$0xff]  }
 0x141   :  { %v231_v45 = vadd.f32 %v230_v41, %v229_v37  ;;  %v243_v46 = vadd.f32 %v242_v42, %v241_v38 }
 0x142   :  { %v237_v47 = vadd.f32 %v236_v43, %v235_v39  ;;  %v249_v48 = vadd.f32 %v248_v44, %v247_v40  ;;  %v310_v36 = vsub.s32 %v307_v32, %v309_v33  ;;  %v221_v43 = vld [vmem:[#allocation7] ss:$4 sm:$0xf] }
 0x143   :  { %v251_v49 = vmul.f32 0.125, %v231_v45  ;;  %v253_v50 = vmul.f32 0.125, %v243_v46  ;;  %v2011_v45 = vsub.s32 3, %v309_v33  ;;  %v223_v46 = vld [vmem:[#allocation7 + $0x1] ss:$4 sm:$0xf] }
 0x144   :  { %v252_v51 = vmul.f32 0.125, %v237_v47  ;;  %v254_v52 = vmul.f32 0.125, %v249_v48  ;;  %v2013_v48 = vsub.s32 1, %v309_v33  ;;  %v1658_v32 = vld [vmem:[#allocation8 + $0x240] ss:$16 sps:$4 sm:$0xff]  }
 0x145   :  { %v1995_v53 = vsub.f32 %v173_v17, %v251_v49  ;;  %v1997_v54 = vsub.f32 %v214_v18, %v253_v50  ;;  %v384_v49 = vld [vmem:[#allocation10 + $0x8] sm:$0xff]  ;;  %v2015_v50 = vsub.s32 0, %v309_v33 }
 0x146   :  { %v1999_v55 = vsub.f32 %v175_v21, %v252_v51  ;;  %v2001_v56 = vsub.f32 %v216_v22, %v254_v52  ;;  %v2017_v51 = vsub.s32 2, %v309_v33  ;;  %vm388_vm2 = vcmp.ge.u32.totalorder %v384_v49, 858993459  ;;  %v1661_v33 = vld [vmem:[#allocation8 + $0x248] ss:$16 sps:$4 sm:$0xff]  }
 0x147   :  { %v259_v57 = vmul.f32 %v1995_v53, %v1995_v53  ;;  %v261_v58 = vmul.f32 %v1997_v54, %v1997_v54  ;;  %v1687_v49 = vld [vmem:[#allocation8 + $0x2cc] ss:$16 sps:$4 sm:$0xff]  }
 0x148   :  { %v260_v59 = vmul.f32 %v1999_v55, %v1999_v55  ;;  %v262_v60 = vmul.f32 %v2001_v56, %v2001_v56 }
 0x149   :  { %v263_v61 = vrot.slane %v259_v57, 4  ;;  %v275_v62 = vrot.slane %v261_v58, 4 }
 0x14a   :  { %v269_v63 = vrot.slane %v260_v59, 4  ;;  %v281_v0 = vrot.slane %v262_v60, 4 }
 0x14b   :  { %v264_v1 = vadd.f32 %v263_v61, %v259_v57  ;;  %v276_v2 = vadd.f32 %v275_v62, %v261_v58  ;;  %v362_v57 = vrot.slane %v223_v46, %v2013_v48  ;;  %v358_v58 = vrot.slane %v223_v46, %v2015_v50  ;;  %v385_v61 = vld [vmem:[#allocation10 + $0x10] sm:$0xff] }
 0x14c   :  { %v270_v3 = vadd.f32 %v269_v63, %v260_v59  ;;  %v282_v4 = vadd.f32 %v281_v0, %v262_v60  ;;  %v383_v59 = vld [vmem:[#allocation10] sm:$0xff]  ;;  %v386_v60 = vld [vmem:[#allocation10 + $0x18] sm:$0xff]  ;;  %v370_v62 = vrot.slane %v223_v46, %v2011_v45  ;;  %v366_v63 = vrot.slane %v223_v46, %v2017_v51 }
 0x14d   :  { %v265_v5 = vrot.slane %v264_v1, 2  ;;  %v277_v6 = vrot.slane %v276_v2, 2  ;;  %vm387_vm3 = vcmp.ge.u32.totalorder %v383_v59, 858993459  ;;  %vm390_vm4 = vcmp.ge.u32.totalorder %v386_v60, 858993459 }
 0x14e   :  { %v271_v7 = vrot.slane %v270_v3, 2  ;;  %v283_v8 = vrot.slane %v282_v4, 2  ;;  %vm389_vm5 = vcmp.ge.u32.totalorder %v385_v61, 858993459  ;;  %v1679_v46 = vld [vmem:[#allocation8 + $0x2a8] ss:$16 sps:$4 sm:$0xff]  }
 0x14f   :  { %v266_v9 = vadd.f32 %v265_v5, %v264_v1  ;;  %v278_v10 = vadd.f32 %v277_v6, %v276_v2  ;;  %v1693_v59 = vld [vmem:[#allocation8 + $0x2ec] ss:$16 sps:$4 sm:$0xff]   ;;  %v1688_v60 = vld [vmem:[#allocation8 + $0x2e0] ss:$16 sps:$4 sm:$0xff]   ;;  %v1691_v61 = vld [vmem:[#allocation8 + $0x2e8] ss:$16 sps:$4 sm:$0xff]  }
 0x150   :  { %v272_v11 = vadd.f32 %v271_v7, %v270_v3  ;;  %v284_v12 = vadd.f32 %v283_v8, %v282_v4 }
 0x151   :  { %v267_v13 = vrot.slane %v266_v9, 1  ;;  %v279_v14 = vrot.slane %v278_v10, 1 }
 0x152   :  { %v273_v15 = vrot.slane %v272_v11, 1  ;;  %v285_v16 = vrot.slane %v284_v12, 1 }
 0x153   :  { %v268_v17 = vadd.f32 %v267_v13, %v266_v9  ;;  %v280_v18 = vadd.f32 %v279_v14, %v278_v10 }
 0x154   :  { %v274_v19 = vadd.f32 %v273_v15, %v272_v11  ;;  %v286_v20 = vadd.f32 %v285_v16, %v284_v12  ;;  %v1899_v12 = vmov 0.0  }
 0x155   :  { %v287_v21 = vmul.f32 0.125, %v268_v17  ;;  %v289_v22 = vmul.f32 0.125, %v280_v18  ;;  %v392_v13 = vsel %vm388_vm2, 1.25, %v1899_v12  ;;  %v391_v14 = vsel %vm387_vm3, 1.25, %v1899_v12 }
 0x156   :  { %v288_v23 = vmul.f32 0.125, %v274_v19  ;;  %v290_v24 = vmul.f32 0.125, %v286_v20  ;;  %v394_v15 = vsel %vm390_vm4, 1.25, %v1899_v12  ;;  %v393_v16 = vsel %vm389_vm5, 1.25, %v1899_v12  ;;  %v1712_v12 = vld [vmem:[#allocation8 + $0x360] ss:$16 sps:$4 sm:$0xff]  }
 0x157   :  { %v291_v25 = vadd.f32 1e-05, %v287_v21  ;;  %v293_v26 = vadd.f32 1e-05, %v289_v22  ;;  %v1646_v22 = vld [vmem:[#allocation8 + $0x200] ss:$16 sps:$4 sm:$0xff]  }
 0x158   :  { %v292_v27 = vadd.f32 1e-05, %v288_v23  ;;  %v294_v28 = vadd.f32 1e-05, %v290_v24  ;;  %v1649_v23 = vld [vmem:[#allocation8 + $0x208] ss:$16 sps:$4 sm:$0xff]  }
 0x159   :  { %1742 = vrsqrt.f32 %v291_v25  ;;  %v1654_v25 = vld [vmem:[#allocation8 + $0x224] ss:$16 sps:$4 sm:$0xff]  }
 0x15a   :  { %1744 = vrsqrt.f32 %v293_v26  ;;  %v1657_v26 = vld [vmem:[#allocation8 + $0x22c] ss:$16 sps:$4 sm:$0xff]  }
 0x15b   :  { %1746 = vrsqrt.f32 %v292_v27 }
 0x15c   :  { %1748 = vrsqrt.f32 %v294_v28  ;;  %v1652_v28 = vld [vmem:[#allocation8 + $0x220] ss:$16 sps:$4 sm:$0xff]  }
 0x163   :  { %v1743_v34 = vpop.eup %1742 }
 0x164   :  { %v1745_v35 = vpop.eup %1744 }
 0x165   :  { %v1747_v37 = vpop.eup %1746 }
 0x166   :  { %v1749_v38 = vpop.eup %1748  ;;  %v303_v39 = vcombine.low %v1743_v34, %v1747_v37  ;;  %v1666_v34 = vld [vmem:[#allocation8 + $0x264] ss:$16 sps:$4 sm:$0xff]   ;;  %v1667_v37 = vld [vmem:[#allocation8 + $0x268] ss:$16 sps:$4 sm:$0xff]  }
 0x167   :  { %v304_v40 = vcombine.low %v1745_v35, %v1749_v38  ;;  %v1669_v35 = vld [vmem:[#allocation8 + $0x26c] ss:$16 sps:$4 sm:$0xff]   ;;  %v1672_v38 = vld [vmem:[#allocation8 + $0x284] ss:$16 sps:$4 sm:$0xff]  }
 0x168   :  { %v311_v41 = vrot.slane %v303_v39, %v310_v36  ;;  %v1675_v39 = vld [vmem:[#allocation8 + $0x28c] ss:$16 sps:$4 sm:$0xff]  }
 0x169   :  { %v318_v42 = vrot.slane %v304_v40, %v310_v36  ;;  %v1670_v40 = vld [vmem:[#allocation8 + $0x280] ss:$16 sps:$4 sm:$0xff]  }
 0x16b   :  { %v319_v44 = vcombine.low %v311_v41, %v318_v42  ;;  %v1673_v41 = vld [vmem:[#allocation8 + $0x288] ss:$16 sps:$4 sm:$0xff]   ;;  %v1678_v42 = vld [vmem:[#allocation8 + $0x2a4] ss:$16 sps:$4 sm:$0xff]  }
 0x16d   :  { %v326_v47 = vrot.slane %v319_v44, %v310_v36  ;;  %v1664_v36 = vld [vmem:[#allocation8 + $0x260] ss:$16 sps:$4 sm:$0xff]  }
 0x16e   :  { %v1676_v44 = vld [vmem:[#allocation8 + $0x2a0] ss:$16 sps:$4 sm:$0xff]  }
 0x16f   :  { %v328_v52 = vmul.f32 %v326_v47, %v221_v43  ;;  %v1681_v43 = vld [vmem:[#allocation8 + $0x2ac] ss:$16 sps:$4 sm:$0xff]   ;;  %v1684_v47 = vld [vmem:[#allocation8 + $0x2c4] ss:$16 sps:$4 sm:$0xff]  }
 0x171   :  { %v345_v0 = vrot.slane %v328_v52, %v2011_v45  ;;  %v337_v1 = vrot.slane %v328_v52, %v2013_v48  ;;  %v333_v2 = vrot.slane %v328_v52, %v2015_v50  ;;  %v341_v3 = vrot.slane %v328_v52, %v2017_v51  ;;  %v1682_v52 = vld [vmem:[#allocation8 + $0x2c0] ss:$16 sps:$4 sm:$0xff]  }
 0x173   :  { %v353_v4 = vmul.f32 %v345_v0, %v2001_v56  ;;  %v351_v5 = vmul.f32 %v337_v1, %v1999_v55  ;;  %v350_v6 = vmul.f32 %v333_v2, %v1995_v53  ;;  %v352_v7 = vmul.f32 %v341_v3, %v1997_v54  ;;  %v1694_v0 = vld [vmem:[#allocation8 + $0x300] ss:$16 sps:$4 sm:$0xff]   ;;  %v1697_v1 = vld [vmem:[#allocation8 + $0x308] ss:$16 sps:$4 sm:$0xff]   ;;  %v1702_v2 = vld [vmem:[#allocation8 + $0x324] ss:$16 sps:$4 sm:$0xff]  }
 0x174   :  { %v1705_v3 = vld [vmem:[#allocation8 + $0x32c] ss:$16 sps:$4 sm:$0xff]  }
 0x175   :  { %v376_v8 = vadd.f32 %v362_v57, %v351_v5  ;;  %v375_v9 = vadd.f32 %v358_v58, %v350_v6  ;;  %v378_v10 = vadd.f32 %v370_v62, %v353_v4  ;;  %v377_v11 = vadd.f32 %v366_v63, %v352_v7  ;;  %v1685_v57 = vld [vmem:[#allocation8 + $0x2c8] ss:$16 sps:$4 sm:$0xff]   ;;  %v1690_v58 = vld [vmem:[#allocation8 + $0x2e4] ss:$16 sps:$4 sm:$0xff]   ;;  %v1699_v63 = vld [vmem:[#allocation8 + $0x30c] ss:$16 sps:$4 sm:$0xff]  }
 0x176   :  { %v1696_v62 = vld [vmem:[#allocation8 + $0x304] ss:$16 sps:$4 sm:$0xff]   ;;  %v1700_v4 = vld [vmem:[#allocation8 + $0x320] ss:$16 sps:$4 sm:$0xff]   ;;  %v1703_v5 = vld [vmem:[#allocation8 + $0x328] ss:$16 sps:$4 sm:$0xff]  }
 0x177   :  { %v380_v17 = vmax.f32 %v376_v8, 0.0  ;;  %v379_v18 = vmax.f32 %v375_v9, 0.0  ;;  %v382_v19 = vmax.f32 %v378_v10, 0.0  ;;  %v381_v56 = vmax.f32 %v377_v11, 0.0  ;;  %v1708_v6 = vld [vmem:[#allocation8 + $0x344] ss:$16 sps:$4 sm:$0xff]  }
 0x178   :  { %v1711_v7 = vld [vmem:[#allocation8 + $0x34c] ss:$16 sps:$4 sm:$0xff]   ;;  %v1706_v8 = vld [vmem:[#allocation8 + $0x340] ss:$16 sps:$4 sm:$0xff]   ;;  %v1709_v9 = vld [vmem:[#allocation8 + $0x348] ss:$16 sps:$4 sm:$0xff]  }
 0x179   :  { %v396_v20 = vmul.f32 %v392_v13, %v380_v17  ;;  %v395_v55 = vmul.f32 %v391_v14, %v379_v18  ;;  %v2032_v21 = vmul.f32 %v393_v16, %v381_v56  ;;  %v398_v53 = vmul.f32 %v394_v15, %v382_v19  ;;  %v1714_v10 = vld [vmem:[#allocation8 + $0x364] ss:$16 sps:$4 sm:$0xff]   ;;  %v1717_v11 = vld [vmem:[#allocation8 + $0x36c] ss:$16 sps:$4 sm:$0xff]   ;;  %v1715_v13 = vld [vmem:[#allocation8 + $0x368] ss:$16 sps:$4 sm:$0xff]  }
 0x17a   :  { %v1720_v14 = vld [vmem:[#allocation8 + $0x384] ss:$16 sps:$4 sm:$0xff]   ;;  %v1723_v15 = vld [vmem:[#allocation8 + $0x38c] ss:$16 sps:$4 sm:$0xff]   ;;  %v1718_v16 = vld [vmem:[#allocation8 + $0x380] ss:$16 sps:$4 sm:$0xff]  }
 0x17b   :  { %v400_v54 = vpack.c.bf16 %v396_v20, %v396_v20  ;;  %v399_v24 = vpack.c.bf16 %v395_v55, %v395_v55  ;;  %v402_v27 = vpack.c.bf16 %v398_v53, %v398_v53  ;;  %v1721_v17 = vld [vmem:[#allocation8 + $0x388] ss:$16 sps:$4 sm:$0xff]   ;;  %v1726_v18 = vld [vmem:[#allocation8 + $0x3a4] ss:$16 sps:$4 sm:$0xff]   ;;  %v1729_v19 = vld [vmem:[#allocation8 + $0x3ac] ss:$16 sps:$4 sm:$0xff]  }
 0x17c   :  { %v1724_v56 = vld [vmem:[#allocation8 + $0x3a0] ss:$16 sps:$4 sm:$0xff]   ;;  %v1727_v20 = vld [vmem:[#allocation8 + $0x3a8] ss:$16 sps:$4 sm:$0xff]   ;;  %v1732_v55 = vld [vmem:[#allocation8 + $0x3c4] ss:$16 sps:$4 sm:$0xff]  }
 0x17d   :  { %1224 = vmatprep.mubr.bf16.mxu0 %v400_v54  ;;  %1306 = vmatprep.mubr.bf16.mxu1 %v400_v54  ;;  %v1735_v53 = vld [vmem:[#allocation8 + $0x3cc] ss:$16 sps:$4 sm:$0xff]   ;;  %v1730_v54 = vld [vmem:[#allocation8 + $0x3c0] ss:$16 sps:$4 sm:$0xff]  }
 0x17e   :  { %1225 = vmatmul.mubr.bf16.vlgmr.msra.gmra.mrb[4].mxu0 %v399_v24  ;;  %1307 = vmatmul.mubr.bf16.vlgmr.msra.gmra.mrb[4].mxu1 %v399_v24  ;;  %v1741_v24 = vld [vmem:[#allocation8 + $0x3ec] ss:$16 sps:$4 sm:$0xff]  }
 0x17f   :  { %1234 = vmatpush1.bf16.msra.mxu0 %v1646_v22  ;;  %1316 = vmatpush1.bf16.msra.mxu1 %v1649_v23  ;;  %v1733_v22 = vld [vmem:[#allocation8 + $0x3c8] ss:$16 sps:$4 sm:$0xff]   ;;  %v1738_v23 = vld [vmem:[#allocation8 + $0x3e4] ss:$16 sps:$4 sm:$0xff]  }
 0x180   :  { %1265 = vmatprep.mubr.bf16.mxu0 %v402_v27  ;;  %1347 = vmatprep.mubr.bf16.mxu1 %v402_v27  ;;  %v401_v27 = vpack.c.bf16 %v2032_v21, %v2032_v21 }
 0x181   :  { %1235 = vmatprep.subr.bf16.mxu0 %v1654_v25  ;;  %1317 = vmatprep.subr.bf16.mxu1 %v1657_v26  ;;  %v1736_v25 = vld [vmem:[#allocation8 + $0x3e0] ss:$16 sps:$4 sm:$0xff]   ;;  %v1739_v26 = vld [vmem:[#allocation8 + $0x3e8] ss:$16 sps:$4 sm:$0xff]  }
 0x183   :  { %1236 = vmatpush1.bf16.msra.mxu0 %v1652_v28  ;;  %1318 = vmatpush1.bf16.msra.mxu1 %v1655_v29  ;;  %v225_v28 = vld [vmem:[#allocation7 + $0x2] ss:$4 sm:$0xf] }
 0x184   :  { %1237 = vmatprep.subr.bf16.mxu0 %v1660_v30  ;;  %1319 = vmatprep.subr.bf16.mxu1 %v1663_v31  ;;  %v535_v29 = vrot.slane %v225_v28, %v2015_v50  ;;  %v543_v30 = vrot.slane %v225_v28, %v2017_v51  ;;  %v539_v31 = vrot.slane %v225_v28, %v2013_v48 }
 0x187   :  { %1238 = vmatpush1.bf16.msra.mxu0 %v1658_v32  ;;  %1320 = vmatpush1.bf16.msra.mxu1 %v1661_v33  ;;  %v547_v32 = vrot.slane %v225_v28, %v2011_v45 }
 0x188   :  { %1239 = vmatprep.subr.bf16.mxu0 %v1666_v34  ;;  %1321 = vmatprep.subr.bf16.mxu1 %v1669_v35 }
 0x18b   :  { %1240 = vmatpush1.bf16.msra.mxu0 %v1664_v36  ;;  %1322 = vmatpush1.bf16.msra.mxu1 %v1667_v37 }
 0x18c   :  { %1241 = vmatprep.subr.bf16.mxu0 %v1672_v38  ;;  %1323 = vmatprep.subr.bf16.mxu1 %v1675_v39 }
 0x18f   :  { %1242 = vmatpush1.bf16.msra.mxu0 %v1670_v40  ;;  %1324 = vmatpush1.bf16.msra.mxu1 %v1673_v41 }
 0x190   :  { %1243 = vmatprep.subr.bf16.mxu0 %v1678_v42  ;;  %1325 = vmatprep.subr.bf16.mxu1 %v1681_v43 }
 0x193   :  { %1244 = vmatpush1.bf16.msra.mxu0 %v1676_v44  ;;  %1326 = vmatpush1.bf16.msra.mxu1 %v1679_v46 }
 0x194   :  { %1245 = vmatprep.subr.bf16.mxu0 %v1684_v47  ;;  %1327 = vmatprep.subr.bf16.mxu1 %v1687_v49 }
 0x197   :  { %1246 = vmatpush1.bf16.msra.mxu0 %v1682_v52  ;;  %1328 = vmatpush1.bf16.msra.mxu1 %v1685_v57 }
 0x198   :  { %1247 = vmatprep.subr.bf16.mxu0 %v1690_v58  ;;  %1329 = vmatprep.subr.bf16.mxu1 %v1693_v59 }
 0x19b   :  { %1248 = vmatpush1.bf16.msra.mxu0 %v1688_v60  ;;  %1330 = vmatpush1.bf16.msra.mxu1 %v1691_v61 }
 0x19c   :  { %1249 = vmatprep.subr.bf16.mxu0 %v1696_v62  ;;  %1331 = vmatprep.subr.bf16.mxu1 %v1699_v63 }
 0x19f   :  { %1250 = vmatpush1.bf16.msra.mxu0 %v1694_v0  ;;  %1332 = vmatpush1.bf16.msra.mxu1 %v1697_v1 }
 0x1a0   :  { %1251 = vmatprep.subr.bf16.mxu0 %v1702_v2  ;;  %1333 = vmatprep.subr.bf16.mxu1 %v1705_v3 }
 0x1a3   :  { %1252 = vmatpush1.bf16.msra.mxu0 %v1700_v4  ;;  %1334 = vmatpush1.bf16.msra.mxu1 %v1703_v5 }
 0x1a4   :  { %1253 = vmatprep.subr.bf16.mxu0 %v1708_v6  ;;  %1335 = vmatprep.subr.bf16.mxu1 %v1711_v7 }
 0x1a7   :  { %1254 = vmatpush1.bf16.msra.mxu0 %v1706_v8  ;;  %1336 = vmatpush1.bf16.msra.mxu1 %v1709_v9 }
 0x1a8   :  { %1255 = vmatprep.subr.bf16.mxu0 %v1714_v10  ;;  %1337 = vmatprep.subr.bf16.mxu1 %v1717_v11 }
 0x1ab   :  { %1256 = vmatpush1.bf16.msra.mxu0 %v1712_v12  ;;  %1338 = vmatpush1.bf16.msra.mxu1 %v1715_v13 }
 0x1ac   :  { %1257 = vmatprep.subr.bf16.mxu0 %v1720_v14  ;;  %1339 = vmatprep.subr.bf16.mxu1 %v1723_v15 }
 0x1af   :  { %1258 = vmatpush1.bf16.msra.mxu0 %v1718_v16  ;;  %1340 = vmatpush1.bf16.msra.mxu1 %v1721_v17 }
 0x1b0   :  { %1259 = vmatprep.subr.bf16.mxu0 %v1726_v18  ;;  %1341 = vmatprep.subr.bf16.mxu1 %v1729_v19 }
 0x1b3   :  { %1260 = vmatpush1.bf16.msra.mxu0 %v1724_v56  ;;  %1342 = vmatpush1.bf16.msra.mxu1 %v1727_v20 }
 0x1b4   :  { %1261 = vmatprep.subr.bf16.mxu0 %v1732_v55  ;;  %1343 = vmatprep.subr.bf16.mxu1 %v1735_v53 }
 0x1b7   :  { %1262 = vmatpush1.bf16.msra.mxu0 %v1730_v54  ;;  %1344 = vmatpush1.bf16.msra.mxu1 %v1733_v22 }
 0x1b8   :  { %1263 = vmatprep.subr.bf16.mxu0 %v1738_v23  ;;  %1345 = vmatprep.subr.bf16.mxu1 %v1741_v24 }
 0x1bb   :  { %1264 = vmatpush1.bf16.msra.mxu0 %v1736_v25  ;;  %1346 = vmatpush1.bf16.msra.mxu1 %v1739_v26 }
 0x1be   :  { %1266 = vmatmul.mubr.bf16.vlgmr.msra.gmra.mrb[4].mxu0 %v401_v27  ;;  %1348 = vmatmul.mubr.bf16.vlgmr.msra.gmra.mrb[4].mxu1 %v401_v27 }
 0x291   :  { %v1267_v33 = vpop.f32.mrb[4].mxu0  ;;  %v1349_v34 = vpop.f32.mrb[4].mxu1 }
 0x292   :  { %v1517_v35 = vadd.f32 %v1267_v33, %v535_v29  ;;  %v1519_v36 = vadd.f32 %v1349_v34, %v543_v30  ;;  %v1269_v37 = vpop.f32.mrb[5].mxu0  ;;  %v1351_v38 = vpop.f32.mrb[5].mxu1 }
 0x293   :  { %v1518_v21 = vadd.f32 %v1269_v37, %v539_v31  ;;  %v1520_v39 = vadd.f32 %v1351_v38, %v547_v32  ;;  %v1271_v40 = vpop.f32.mrb[6].mxu0  ;;  %v1353_v41 = vpop.f32.mrb[6].mxu1 }
 0x294   :  { %1356 = vst [vmem:[#allocation11] sm:$0xff] %v1517_v35  ;;  %1358 = vst [vmem:[#allocation11 + $0x10] sm:$0xff] %v1519_v36  ;;  %v1272_v50 = vpop.f32.mrb[7].mxu0  ;;  %v1354_v51 = vpop.f32.mrb[7].mxu1 }
 0x295   :  { %1357 = vst [vmem:[#allocation11 + $0x8] sm:$0xff] %v1518_v21  ;;  %1359 = vst [vmem:[#allocation11 + $0x18] sm:$0xff] %v1520_v39 }
 0x296   :  { %1871 = shalt.err (!%p1868_p2)
}
 0x297   :  { %s1872_s28 = scalar_lea.hbm %s2057_s5, 512 }
 0x298   :  { %p1873_p3 = scmp.ne.s32.totalorder %s2057_s5, %s1872_s28  ;;  %p1876_p4 = scmp.lt.u32.totalorder %s1872_s28, %s2057_s5 }
 0x29a   :  { %p1878_p5 = pnand %p1876_p4, %p1873_p3 }
 0x29c   :  { %1881 = shalt.err (!%p1878_p5)
}
 0x29d   :  { %1369 = dma.vmem_to_hbm [thread:$0]  %s1367_s25, 512, %s2057_s5, [#allocation4]  }
 0x29e   :  { %1888 = dma.done.wait [#allocation4], 512  }
 0x29f   :  { %1889 = vsyncadd [#allocation4], 4294966784 }
 0x2a0   :  { %1373 = vsyncpa [#allocation3], 1 }
 0x2a1   :  { %1374 = vsyncpa [#allocation6], 1 }
 0x2a2   :  { %1375 = vsyncpa [#allocation9], 1 }
 0x2a3   :  { %1376 = vsyncpa [#allocation4], 1 }

</bundles_post_ra>
